<compile_context>
chip_gen: v7x
topology: tpu7x:2x2x1
jax: 0.10.0
libtpu: 0.0.40
codegen_flags: <defaults>
</compile_context>

<pallas_src>
import functools

import jax
import jax.numpy as jnp
from jax.experimental import pallas as pl
from jax.experimental.pallas import tpu as pltpu


MAX_TM = 512      # row tile
MAX_TK = 2048     # reduction tile (A columns / Z rows)


def _round_up(x, m):
    return ((x + m - 1) // m) * m


@functools.lru_cache(maxsize=None)
def _vmem_limit():
    """Generation-aware VMEM budget (leave headroom for the compiler)."""
    cap = 128 * 1024 * 1024
    try:
        info = pltpu.get_tpu_info()
        cap = int(getattr(info, "vmem_capacity_bytes", cap))
    except Exception:
        pass
    return min(96 * 1024 * 1024, int(cap * 0.75))


def _pick_tiles(n):
    """Pick (n_pad, tm, tk): tm | tk | n_pad, all multiples of 128."""
    tm = min(MAX_TM, _round_up(max(n, 1), 128))
    n_pad = _round_up(max(n, 1), tm)
    n_row_tiles = n_pad // tm
    max_mult = max(1, MAX_TK // tm)
    mult = 1
    for c in range(1, max_mult + 1):
        if n_row_tiles % c == 0:
            mult = c
    tk = mult * tm
    return n_pad, tm, tk


def _z_resident_ok(n_pad, h_pad):
    # Conservative: assume the resident block could be double-buffered; keep
    # it to <= 1/3 of the budget so A tiles + acc + bias still fit.
    return 2 * n_pad * h_pad * 2 <= _vmem_limit() // 3     # bf16 itemsize = 2


def _elu(x):
    # ELU alpha=1.0 (F.elu default); clamp the exp arg so it never infs.
    return jnp.where(x > 0, x, jnp.exp(jnp.minimum(x, 0.0)) - 1.0)


# ----------------------------------------------------------------------------
# Kernels
# ----------------------------------------------------------------------------
def scaled_matmul_kernel(x_ref, w_ref, dinv_ref, o_ref):
    """Z[i_tile] = dinv[i_tile] * (X[i_tile] @ W), emitted in bf16."""
    xw = jnp.dot(x_ref[...].astype(jnp.float32), w_ref[...],
                 preferred_element_type=jnp.float32)
    o_ref[...] = (xw * dinv_ref[...]).astype(o_ref.dtype)


def gcn_agg_kernel(a_ref, z_ref, dinv_ref, b_ref, o_ref, acc_ref,
                   *, z_resident, tk):
    """H[i] = elu(dinv[i] * sum_k (A+I)[i,k] @ Z[k] + b), stored in bf16.

    Grid = (row tiles 'parallel', reduction tiles 'arbitrary'); f32 VMEM
    accumulator; epilogue under pl.when on the last reduction step.
    bf16 A tile x bf16 Z tile on the MXU with an f32 accumulator.
    """
    k = pl.program_id(1)

    @pl.when(k == 0)
    def _():
        acc_ref[...] = jnp.zeros_like(acc_ref)

    if z_resident:
        start = pl.multiple_of(k * tk, 128)
        z = z_ref[pl.ds(start, tk), :]
    else:
        z = z_ref[...]
    acc_ref[...] += jnp.dot(a_ref[...], z, preferred_element_type=jnp.float32)

    @pl.when(k == pl.num_programs(1) - 1)
    def _():
        h = _elu(acc_ref[...] * dinv_ref[...] + b_ref[...])
        o_ref[...] = h.astype(o_ref.dtype)


def gcn_agg_pool_kernel(a_ref, z_ref, dinv_ref, b_ref, p_ref, o_ref, acc_ref,
                        *, z_resident, tk):
    """Second GCN layer with scatter_mean pooling fused in, per row tile:
         h[i]            = elu(dinv[i] * sum_k (A+I)[i,k] @ Z[k] + b)
         partial_pool[i] = P[:, i_tile] @ h[i]
       Partial pooled sums are written per row tile (row axis stays 'parallel'
       for megacore) and reduced by a tiny XLA sum outside the kernel.
    """
    k = pl.program_id(1)

    @pl.when(k == 0)
    def _():
        acc_ref[...] = jnp.zeros_like(acc_ref)

    if z_resident:
        start = pl.multiple_of(k * tk, 128)
        z = z_ref[pl.ds(start, tk), :]
    else:
        z = z_ref[...]
    acc_ref[...] += jnp.dot(a_ref[...], z, preferred_element_type=jnp.float32)

    @pl.when(k == pl.num_programs(1) - 1)
    def _():
        h = _elu(acc_ref[...] * dinv_ref[...] + b_ref[...])
        o_ref[...] = jnp.dot(p_ref[...], h, preferred_element_type=jnp.float32)


def fc_logsoftmax_kernel(xa_ref, xb_ref, wa_ref, wb_ref, b_ref, o_ref):
    """logits = xa @ W_td + xb @ W_bu + b ; out = log_softmax(logits, -1).

    Consumes both branches without an XLA concatenate.  Padded class columns
    carry a -1e30 bias so they contribute ~0 to the softmax denominator.
    """
    logits = (jnp.dot(xa_ref[...], wa_ref[...],
                      preferred_element_type=jnp.float32)
              + jnp.dot(xb_ref[...], wb_ref[...],
                        preferred_element_type=jnp.float32)
              + b_ref[...])
    m = jnp.max(logits, axis=-1, keepdims=True)
    z = logits - m
    lse = jnp.log(jnp.sum(jnp.exp(z), axis=-1, keepdims=True))
    o_ref[...] = z - lse


# ----------------------------------------------------------------------------
# pallas_call wrappers
# ----------------------------------------------------------------------------
def scaled_matmul(x, w, dinv, tm):
    n_pad, f_pad = x.shape
    h_pad = w.shape[1]
    return pl.pallas_call(
        scaled_matmul_kernel,
        out_shape=jax.ShapeDtypeStruct((n_pad, h_pad), jnp.bfloat16),
        grid_spec=pltpu.PrefetchScalarGridSpec(
            num_scalar_prefetch=0,
            grid=(n_pad // tm,),
            in_specs=[pl.BlockSpec((tm, f_pad), lambda i: (i, 0)),
                      pl.BlockSpec((f_pad, h_pad), lambda i: (0, 0)),
                      pl.BlockSpec((tm, 1), lambda i: (i, 0))],
            out_specs=pl.BlockSpec((tm, h_pad), lambda i: (i, 0))),
        compiler_params=pltpu.CompilerParams(
            dimension_semantics=("parallel",),
            vmem_limit_bytes=_vmem_limit()),
    )(x, w, dinv)


def gcn_aggregate(a_pi, z, dinv, b, tm, tk):
    n_pad = a_pi.shape[0]
    h_pad = z.shape[1]
    z_resident = _z_resident_ok(n_pad, h_pad)
    if z_resident:
        z_spec = pl.BlockSpec((n_pad, h_pad), lambda i, k: (0, 0))
    else:
        z_spec = pl.BlockSpec((tk, h_pad), lambda i, k: (k, 0))
    kernel = functools.partial(gcn_agg_kernel, z_resident=z_resident, tk=tk)
    return pl.pallas_call(
        kernel,
        out_shape=jax.ShapeDtypeStruct((n_pad, h_pad), jnp.bfloat16),
        grid_spec=pltpu.PrefetchScalarGridSpec(
            num_scalar_prefetch=0,
            grid=(n_pad // tm, n_pad // tk),
            in_specs=[pl.BlockSpec((tm, tk), lambda i, k: (i, k)),
                      z_spec,
                      pl.BlockSpec((tm, 1), lambda i, k: (i, 0)),
                      pl.BlockSpec((1, h_pad), lambda i, k: (0, 0))],
            out_specs=pl.BlockSpec((tm, h_pad), lambda i, k: (i, 0)),
            scratch_shapes=[pltpu.VMEM((tm, h_pad), jnp.float32)]),
        compiler_params=pltpu.CompilerParams(
            dimension_semantics=("parallel", "arbitrary"),
            vmem_limit_bytes=_vmem_limit()),
    )(a_pi, z, dinv, b)


def gcn_aggregate_pool(a_pi, z, dinv, b, pool, tm, tk):
    n_pad = a_pi.shape[0]
    o_pad = z.shape[1]
    g_pad = pool.shape[0]
    n_rows = n_pad // tm
    z_resident = _z_resident_ok(n_pad, o_pad)
    if z_resident:
        z_spec = pl.BlockSpec((n_pad, o_pad), lambda i, k: (0, 0))
    else:
        z_spec = pl.BlockSpec((tk, o_pad), lambda i, k: (k, 0))
    kernel = functools.partial(gcn_agg_pool_kernel, z_resident=z_resident, tk=tk)
    partial_pool = pl.pallas_call(
        kernel,
        out_shape=jax.ShapeDtypeStruct((n_rows, g_pad, o_pad), jnp.float32),
        grid_spec=pltpu.PrefetchScalarGridSpec(
            num_scalar_prefetch=0,
            grid=(n_rows, n_pad // tk),
            in_specs=[pl.BlockSpec((tm, tk), lambda i, k: (i, k)),
                      z_spec,
                      pl.BlockSpec((tm, 1), lambda i, k: (i, 0)),
                      pl.BlockSpec((1, o_pad), lambda i, k: (0, 0)),
                      pl.BlockSpec((g_pad, tm), lambda i, k: (0, i))],
            out_specs=pl.BlockSpec((None, g_pad, o_pad),
                                   lambda i, k: (i, 0, 0)),
            scratch_shapes=[pltpu.VMEM((tm, o_pad), jnp.float32)]),
        compiler_params=pltpu.CompilerParams(
            dimension_semantics=("parallel", "arbitrary"),
            vmem_limit_bytes=_vmem_limit()),
    )(a_pi, z, dinv, b, pool)
    # Tiny XLA reduction over the row-tile axis (keeps the row grid axis
    # 'parallel' so v7x megacore can split it).
    return partial_pool.sum(axis=0)


def fc_log_softmax(xa, xb, wa, wb, b):
    g_pad = xa.shape[0]
    c_pad = wa.shape[1]
    vm = pl.BlockSpec(memory_space=pltpu.MemorySpace.VMEM)
    return pl.pallas_call(
        fc_logsoftmax_kernel,
        out_shape=jax.ShapeDtypeStruct((g_pad, c_pad), jnp.float32),
        in_specs=[vm] * 5,
        out_specs=vm,
        compiler_params=pltpu.CompilerParams(
            vmem_limit_bytes=_vmem_limit()),
    )(xa, xb, wa, wb, b)


# ----------------------------------------------------------------------------
# One-time graph precompute (hoisted out of the hot forward path):
# (A + I) in bf16 (entries are small exact integers), dinv = deg^-1/2, pooling
# matrix P (scatter_mean as a matmul).
# ----------------------------------------------------------------------------
def build_adj(edge_index, num_nodes, n_pad):
    src, dst = edge_index[0], edge_index[1]
    a = jnp.zeros((n_pad, n_pad), jnp.float32)
    a = a.at[dst, src].add(1.0)
    diag = (jnp.arange(n_pad) < num_nodes).astype(jnp.float32)
    a = a + jnp.diag(diag)                      # self-loops for real nodes only
    deg = a.sum(axis=1)
    dinv = jnp.where(deg > 0.0, 1.0 / jnp.sqrt(deg), 0.0)
    return a.astype(jnp.bfloat16), dinv.reshape(n_pad, 1).astype(jnp.float32)


def build_pool_matrix(batch, num_graphs, g_pad, n_pad):
    n = batch.shape[0]
    batch_pad = jnp.full((n_pad,), -1, dtype=jnp.int32)
    batch_pad = batch_pad.at[:n].set(batch.astype(jnp.int32))
    onehot = (batch_pad[None, :] ==
              jnp.arange(g_pad, dtype=jnp.int32)[:, None]).astype(jnp.float32)
    counts = jnp.maximum(onehot.sum(axis=1, keepdims=True), 1.0)
    return onehot / counts


def precompute_graph(edge_index, bu_edge_index, batch, num_nodes, num_graphs):
    """Call ONCE per graph; reuse the result across forward calls."""
    n_pad, tm, tk = _pick_tiles(num_nodes)
    g_pad = _round_up(num_graphs, 8)
    a_td, dinv_td = build_adj(edge_index, num_nodes, n_pad)
    a_bu, dinv_bu = build_adj(bu_edge_index, num_nodes, n_pad)
    pool = build_pool_matrix(batch, num_graphs, g_pad, n_pad)
    return {"a_td": a_td, "dinv_td": dinv_td,
            "a_bu": a_bu, "dinv_bu": dinv_bu,
            "pool": pool,
            "n_pad": n_pad, "tm": tm, "tk": tk, "g_pad": g_pad}


def _pad2(x, rows, cols, value=0.0):
    return jnp.pad(x, ((0, rows - x.shape[0]), (0, cols - x.shape[1])),
                   constant_values=value)


# ----------------------------------------------------------------------------
# Model wrapper
# ----------------------------------------------------------------------------
def init_params(key, input_dim, hidden_dim, output_dim, num_class):
    ks = jax.random.split(key, 6)

    def glorot(k, fan_in, fan_out):
        lim = jnp.sqrt(6.0 / (fan_in + fan_out))
        return jax.random.uniform(k, (fan_in, fan_out), jnp.float32, -lim, lim)

    return {
        "w1": glorot(ks[0], input_dim, hidden_dim),
        "b1": jnp.zeros((1, hidden_dim), jnp.float32),
        "w2": glorot(ks[1], hidden_dim, output_dim),
        "b2": jnp.zeros((1, output_dim), jnp.float32),
        "w3": glorot(ks[2], input_dim, hidden_dim),
        "b3": jnp.zeros((1, hidden_dim), jnp.float32),
        "w4": glorot(ks[3], hidden_dim, output_dim),
        "b4": jnp.zeros((1, output_dim), jnp.float32),
        "wfc": glorot(ks[4], output_dim * 2, num_class),
        "bfc": 0.01 * jax.random.normal(ks[5], (1, num_class), jnp.float32),
    }


def pretrained_gcn_forward(params, x, graph, num_graphs):
    n, f = x.shape
    hid = params["w1"].shape[1]
    out_dim = params["w2"].shape[1]
    num_class = params["wfc"].shape[1]

    n_pad, tm, tk, g_pad = (graph["n_pad"], graph["tm"], graph["tk"],
                            graph["g_pad"])
    f_pad = _round_up(f, 128)
    h_pad = _round_up(hid, 128)
    o_pad = _round_up(out_dim, 128)
    c_pad = _round_up(num_class, 128)

    # Padded operands (lane-dense, tile-aligned).
    x_p = _pad2(x, n_pad, f_pad)
    pool = graph["pool"]

    w1 = _pad2(params["w1"], f_pad, h_pad); b1 = _pad2(params["b1"], 1, h_pad)
    w2 = _pad2(params["w2"], h_pad, o_pad); b2 = _pad2(params["b2"], 1, o_pad)
    w3 = _pad2(params["w3"], f_pad, h_pad); b3 = _pad2(params["b3"], 1, h_pad)
    w4 = _pad2(params["w4"], h_pad, o_pad); b4 = _pad2(params["b4"], 1, o_pad)
    wfc_td = _pad2(params["wfc"][:out_dim], o_pad, c_pad)
    wfc_bu = _pad2(params["wfc"][out_dim:], o_pad, c_pad)
    bfc = _pad2(params["bfc"], 1, c_pad, value=-1e30)   # mask padded classes

    def branch(a_pi, dinv, wa, ba, wb, bb):
        z1 = scaled_matmul(x_p, wa, dinv, tm)            # bf16 dinv*(X @ W)
        h1 = gcn_aggregate(a_pi, z1, dinv, ba, tm, tk)   # bf16 elu(A_hat@XW+b)
        z2 = scaled_matmul(h1, wb, dinv, tm)             # bf16 dinv*(h1 @ W')
        return gcn_aggregate_pool(a_pi, z2, dinv, bb, pool, tm, tk)  # P @ h2

    pooled_td = branch(graph["a_td"], graph["dinv_td"], w1, b1, w2, b2)
    pooled_bu = branch(graph["a_bu"], graph["dinv_bu"], w3, b3, w4, b4)

    out = fc_log_softmax(pooled_td, pooled_bu, wfc_td, wfc_bu, bfc)
    return out[:num_graphs, :num_class]


# ----------------------------------------------------------------------------
# Pure-JAX reference (unpadded, f32) for correctness checking
# ----------------------------------------------------------------------------
def reference_forward(params, x, edge_index, bu_edge_index, batch, num_graphs):
    n = x.shape[0]

    def norm_adj(ei):
        a = jnp.zeros((n, n), jnp.float32).at[ei[1], ei[0]].add(1.0)
        a = a + jnp.eye(n, dtype=jnp.float32)
        deg = a.sum(axis=1)
        dinv = jnp.where(deg > 0, 1.0 / jnp.sqrt(deg), 0.0)
        return dinv[:, None] * a * dinv[None, :]

    a_td = norm_adj(edge_index)
    a_bu = norm_adj(bu_edge_index)
    onehot = (batch[None, :] ==
              jnp.arange(num_graphs)[:, None]).astype(jnp.float32)
    pool = onehot / jnp.maximum(onehot.sum(axis=1, keepdims=True), 1.0)

    def branch(a, w1, b1, w2, b2):
        h = jax.nn.elu(a @ (x @ w1) + b1)
        h = jax.nn.elu(a @ (h @ w2) + b2)
        return pool @ h

    xt = branch(a_td, params["w1"], params["b1"], params["w2"], params["b2"])
    xb = branch(a_bu, params["w3"], params["b3"], params["w4"], params["b4"])
    logits = jnp.concatenate([xt, xb], axis=1) @ params["wfc"] + params["bfc"]
    return jax.nn.log_softmax(logits, axis=1)


if __name__ == "__main__":
    # Small synthetic problem: 2 graphs x 8 nodes = 16 nodes
    input_dim, hidden_dim, output_dim, num_class = 8, 16, 8, 4
    num_graphs, nodes_per_graph = 2, 8
    n = num_graphs * nodes_per_graph

    key = jax.random.PRNGKey(0)
    kx, kp = jax.random.split(key)
    x = jax.random.normal(kx, (n, input_dim), jnp.float32)

    # Deterministic tree edges per graph (parent -> child), top-down.
    tree = [(0, 1), (0, 2), (1, 3), (1, 4), (2, 5), (2, 6), (3, 7)]
    src, dst = [], []
    for g in range(num_graphs):
        off = g * nodes_per_graph
        for p, c in tree:
            src.append(p + off)
            dst.append(c + off)
    edge_index = jnp.array([src, dst], dtype=jnp.int32)        # TD
    bu_edge_index = jnp.array([dst, src], dtype=jnp.int32)     # BU (reversed)
    batch = jnp.repeat(jnp.arange(num_graphs, dtype=jnp.int32),
                       nodes_per_graph)

    params = init_params(kp, input_dim, hidden_dim, output_dim, num_class)

    # Graph structure is built once and reused across forward calls.
    graph = precompute_graph(edge_index, bu_edge_index, batch, n, num_graphs)

    out = pretrained_gcn_forward(params, x, graph, num_graphs)
    out = jax.block_until_ready(out)

    ref = reference_forward(params, x, edge_index, bu_edge_index, batch,
                            num_graphs)
    assert out.shape == (num_graphs, num_class)
    # bf16 intermediates (A, Z, h1) vs. the f32 reference: allow ~1e-2 error.
    assert jnp.allclose(out, ref, atol=5e-2, rtol=5e-2), "mismatch vs reference"

    print("KERNEL_OK")
</pallas_src>

<mosaic_0001>
module attributes {stable_mosaic.version = 11 : i64} {
  func.func @scaled_matmul_kernel(%arg0: i32, %arg1: memref<128x128xf32, #tpu.memory_space<vmem>>, %arg2: memref<128x128xf32, #tpu.memory_space<vmem>>, %arg3: memref<128x1xf32, #tpu.memory_space<vmem>>, %arg4: memref<128x128xbf16, #tpu.memory_space<vmem>>) attributes {dimension_semantics = [#tpu.dimension_semantics<parallel>], iteration_bounds = array<i64: 1>, scalar_prefetch = 0 : i64, scratch_operands = 0 : i64, tpu.core_type = #tpu.core_type<tc>, window_params = [{transform_indices = @transform_0, window_bounds = array<i64: 128, 128>}, {pipeline_mode = #tpu.pipeline_mode<synchronous>, transform_indices = @transform_1, window_bounds = array<i64: 128, 128>}, {transform_indices = @transform_2, window_bounds = array<i64: 128, 1>}, {transform_indices = @transform_3, window_bounds = array<i64: 128, 128>}]} {
    %c0 = arith.constant 0 : index
    %c0_0 = arith.constant 0 : index
    %0 = vector.load %arg1[%c0, %c0_0] : memref<128x128xf32, #tpu.memory_space<vmem>>, vector<128x128xf32>
    %c0_1 = arith.constant 0 : index
    %c0_2 = arith.constant 0 : index
    %1 = vector.load %arg2[%c0_1, %c0_2] : memref<128x128xf32, #tpu.memory_space<vmem>>, vector<128x128xf32>
    %cst = arith.constant dense<0.000000e+00> : vector<128x128xf32>
    %2 = tpu.matmul %0, %1, %cst {dimension_numbers = #tpu.dot_dimension_numbers<[1], [0], [0], [1], [0, 0, 1, 1], [], []>} : vector<128x128xf32>, vector<128x128xf32>, vector<128x128xf32> -> vector<128x128xf32>
    %c0_3 = arith.constant 0 : index
    %c0_4 = arith.constant 0 : index
    %3 = vector.load %arg3[%c0_3, %c0_4] : memref<128x1xf32, #tpu.memory_space<vmem>>, vector<128x1xf32>
    %4 = vector.broadcast %3 : vector<128x1xf32> to vector<128x128xf32>
    %5 = arith.mulf %2, %4 : vector<128x128xf32>
    %6 = arith.truncf %5 : vector<128x128xf32> to vector<128x128xbf16>
    %c0_5 = arith.constant 0 : index
    %c0_6 = arith.constant 0 : index
    %7 = vector.load %arg4[%c0_5, %c0_6] : memref<128x128xbf16, #tpu.memory_space<vmem>>, vector<128x128xbf16>
    tpu.vector_store %arg4[%c0_5, %c0_6], %6 {strides = array<i32>} : memref<128x128xbf16, #tpu.memory_space<vmem>>, vector<128x128xbf16>,
    return
  }
  func.func @transform_0(%arg0: i32) -> (i32, i32) {
    %c0_i32 = arith.constant 0 : i32
    %c0_i32_0 = arith.constant 0 : i32
    return %arg0, %c0_i32 : i32, i32
  }
  func.func @transform_1(%arg0: i32) -> (i32, i32) {
    %c0_i32 = arith.constant 0 : i32
    %c0_i32_0 = arith.constant 0 : i32
    %c0_i32_1 = arith.constant 0 : i32
    return %c0_i32, %c0_i32_0 : i32, i32
  }
  func.func @transform_2(%arg0: i32) -> (i32, i32) {
    %c0_i32 = arith.constant 0 : i32
    %c0_i32_0 = arith.constant 0 : i32
    return %arg0, %c0_i32 : i32, i32
  }
  func.func @transform_3(%arg0: i32) -> (i32, i32) {
    %c0_i32 = arith.constant 0 : i32
    %c0_i32_0 = arith.constant 0 : i32
    return %arg0, %c0_i32 : i32, i32
  }
}

</mosaic_0001>

<bundles_post_ra>
// kernel: tpu_custom_call.1
= control target key start
LH: loop header
LB: loop body
LE: loop exit
PB: predicated region body
PF: predicated region fallthrough
CT: control target
= control target key end

     0   :  { %8 = vsyncpa [#allocation3], 0  ;;  %s856_s0 = inlined_call_operand.hbm [shape: f32[128,128], index: 0, kind: input, shape index: {}]   ;;  %s857_s1 = inlined_call_operand.hbm [shape: f32[128,128], index: 1, kind: input, shape index: {}]   ;;  %s858_s2 = inlined_call_operand.hbm [shape: f32[128,1], index: 2, kind: input, shape index: {}]   ;;  %s859_s3 = inlined_call_operand.hbm [shape: bf16[128,128], index: 3, kind: output, shape index: {}]  }
   0x1   :  { %9 = vsyncpa [#allocation6], 0 }
   0x2   :  { %10 = vsyncpa [#allocation4], 0  ;;  %s763_s12 = smov [#allocation5]   ;;  %s764_s14 = smov [#allocation2]  }
   0x3   :  { %s28_s13 = sshll.u32 %s763_s12, 4  ;;  %s16_s15 = sshll.u32 %s764_s14, 4  ;;  %s29_s13 = int_to_ptr.vmem [resolvable:$true] %s28_s13  ;;  %s792_s15 = int_to_ptr.vmem [resolvable:$true] %s16_s15 }
   0x4   :  { %s669_s18 = scalar_lea.hbm %s857_s1, 2048 }
   0x5   :  { %p670_p0 = scmp.ne.s32.totalorder %s857_s1, %s669_s18  ;;  %p673_p1 = scmp.lt.u32.totalorder %s669_s18, %s857_s1 }
   0x7   :  { %p675_p2 = pnand %p673_p1, %p670_p0 }
   0x9   :  { %678 = shalt.err (!%p675_p2)
}
   0xa   :  { %s679_s23 = scalar_lea.vmem %s29_s13, 2048  ;;  %p684_p4 = scmp.lt.s32.totalorder %s29_s13, %s29_s13 }
   0xb   :  { %p680_p3 = scmp.ne.s32.totalorder %s29_s13, %s679_s23  ;;  %p685_p5 = scmp.lt.s32.totalorder %s679_s23, %s679_s23 }
   0xd   :  { %p686_p6 = por %p685_p5, %p684_p4 }
   0xf   :  { %p687_p7 = pnand %p686_p6, %p680_p3 }
  0x11   :  { %690 = shalt.err (!%p687_p7)
}
  0x12   :  { %s765_s24 = smov 128   ;;  %s766_s25 = smov 8  }
  0x13   :  { %34 = dma.hbm_to_vmem [thread:$0]  %s857_s1, 2048, %s29_s13, [#allocation6], %s765_s24, %s765_s24, %s766_s25  }
  0x14   :  { %s691_s30 = scalar_lea.hbm %s856_s0, 2048 }
  0x15   :  { %p692_p8 = scmp.ne.s32.totalorder %s856_s0, %s691_s30  ;;  %p695_p9 = scmp.lt.u32.totalorder %s691_s30, %s856_s0 }
  0x17   :  { %p697_p10 = pnand %p695_p9, %p692_p8 }
  0x19   :  { %700 = shalt.err (!%p697_p10)
}
  0x1a   :  { %s701_s8 = scalar_lea.vmem %s792_s15, 2048  ;;  %p706_p12 = scmp.lt.s32.totalorder %s792_s15, %s792_s15 }
  0x1b   :  { %p702_p11 = scmp.ne.s32.totalorder %s792_s15, %s701_s8  ;;  %p707_p13 = scmp.lt.s32.totalorder %s701_s8, %s701_s8 }
  0x1d   :  { %p708_p0 = por %p707_p13, %p706_p12 }
  0x1f   :  { %p709_p1 = pnand %p708_p0, %p702_p11 }
  0x21   :  { %712 = shalt.err (!%p709_p1)
}
  0x22   :  { %22 = dma.hbm_to_vmem [thread:$0]  %s856_s0, 2048, %s792_s15, [#allocation3], %s765_s24, %s765_s24, %s766_s25  }
  0x23   :  { %s767_s10 = smov [#allocation7]   ;;  %s713_s14 = scalar_lea.hbm %s858_s2, 2048 }
  0x24   :  { %s40_s11 = sshll.u32 %s767_s10, 4  ;;  %p714_p2 = scmp.ne.s32.totalorder %s858_s2, %s713_s14  ;;  %s41_s11 = int_to_ptr.vmem [resolvable:$true] %s40_s11 }
  0x25   :  { %p717_p3 = scmp.lt.u32.totalorder %s713_s14, %s858_s2 }
  0x27   :  { %p719_p4 = pnand %p717_p3, %p714_p2 }
  0x29   :  { %722 = shalt.err (!%p719_p4)
}
  0x2a   :  { %s723_s20 = scalar_lea.vmem %s41_s11, 2048  ;;  %p728_p6 = scmp.lt.s32.totalorder %s41_s11, %s41_s11 }
  0x2b   :  { %p724_p5 = scmp.ne.s32.totalorder %s41_s11, %s723_s20  ;;  %p729_p7 = scmp.lt.s32.totalorder %s723_s20, %s723_s20 }
  0x2d   :  { %p730_p8 = por %p729_p7, %p728_p6 }
  0x2f   :  { %p731_p9 = pnand %p730_p8, %p724_p5 }
  0x31   :  { %734 = shalt.err (!%p731_p9)
}
  0x32   :  { %46 = dma.hbm_to_vmem [thread:$0]  %s858_s2, 2048, %s41_s11, [#allocation6], %s765_s24, %s765_s24, %s766_s25  }
  0x33   :  { %757 = dma.done.wait [#allocation3], 2048  }
  0x34   :  { %758 = vsyncadd [#allocation3], 4294965248 }
  0x35   :  { %759 = dma.done.wait [#allocation6], 4096  }
  0x36   :  { %760 = vsyncadd [#allocation6], 4294963200  ;;  %v768_v0 = vmov 0   ;;  %v72_v1 = vld [vmem:[#allocation5] sm:$0xff]  ;;  %v73_v2 = vld [vmem:[#allocation5 + $0x8] sm:$0xff]  ;;  %s769_s2 = smov [#allocation8]  }
  0x37   :  { %668 = vset.pattern.permute.xlu1 %v768_v0  ;;  %667 = vset.pattern.permute.xlu0 %v768_v0  ;;  %v74_v3 = vld [vmem:[#allocation5 + $0x10] sm:$0xff]  ;;  %v610_v4 = vpack.c.bf16 %v73_v2, %v72_v1  ;;  %v75_v5 = vld [vmem:[#allocation5 + $0x18] sm:$0xff]  ;;  %v76_v7 = vld [vmem:[#allocation5 + $0x20] sm:$0xff]  ;;  %s430_s21 = sshll.u32 %s769_s2, 4  ;;  %s431_s21 = int_to_ptr.vmem [resolvable:$true] %s430_s21 }
  0x38   :  { %v614_v6 = vpack.c.bf16 %v75_v5, %v74_v3  ;;  %v77_v8 = vld [vmem:[#allocation5 + $0x28] sm:$0xff]  ;;  %v56_v10 = vld [vmem:[#allocation2] sm:$0xff]  ;;  %v78_v12 = vld [vmem:[#allocation5 + $0x30] sm:$0xff]  ;;  %s735_s22 = scalar_lea.vmem %s431_s21, 1024  ;;  %p740_p11 = scmp.lt.s32.totalorder %s431_s21, %s431_s21 }
  0x39   :  { %611 = vmatprep.subr.bf16.mxu0 %v610_v4  ;;  %642 = vmatprep.subr.bf16.mxu1 %v610_v4  ;;  %v618_v9 = vpack.c.bf16 %v77_v8, %v76_v7  ;;  %v64_v11 = vld [vmem:[#allocation2 + $0x40] sm:$0xff]  ;;  %v79_v13 = vld [vmem:[#allocation5 + $0x38] sm:$0xff]  ;;  %v81_v16 = vld [vmem:[#allocation5 + $0x48] sm:$0xff]  ;;  %p736_p10 = scmp.ne.s32.totalorder %s431_s21, %s735_s22  ;;  %p741_p12 = scmp.lt.s32.totalorder %s735_s22, %s735_s22 }
  0x3a   :  { %613 = vmatpush3.bf16.msra.mxu0 %v610_v4  ;;  %650 = vmatpush3.bf16.msra.mxu1 %v610_v4  ;;  %v622_v14 = vpack.c.bf16 %v79_v13, %v78_v12  ;;  %v80_v15 = vld [vmem:[#allocation5 + $0x40] sm:$0xff]  ;;  %v235_v17 = vld [vmem:[#allocation7 + $0x10] sm:$0xff]  ;;  %v236_v19 = vld [vmem:[#allocation7 + $0x18] sm:$0xff] }
  0x3b   :  { %615 = vmatprep.subr.bf16.mxu0 %v614_v6  ;;  %643 = vmatprep.subr.bf16.mxu1 %v614_v6  ;;  %v233_v18 = vld [vmem:[#allocation7] sm:$0xff]  ;;  %v626_v20 = vpack.c.bf16 %v81_v16, %v80_v15  ;;  %v82_v21 = vld [vmem:[#allocation5 + $0x50] sm:$0xff]  ;;  %v83_v22 = vld [vmem:[#allocation5 + $0x58] sm:$0xff]  ;;  %p742_p13 = por %p741_p12, %p740_p11 }
  0x3c   :  { %586 = vmatprep.mubr.f32.mxu0 %v56_v10  ;;  %598 = vmatprep.mubr.f32.mxu1 %v64_v11  ;;  %v234_v23 = vld [vmem:[#allocation7 + $0x8] sm:$0xff]  ;;  %v630_v25 = vpack.c.bf16 %v83_v22, %v82_v21  ;;  %v84_v26 = vld [vmem:[#allocation5 + $0x60] sm:$0xff]  ;;  %v240_v29 = vld [vmem:[#allocation7 + $0x38] sm:$0xff] }
  0x3d   :  { %261 = vperm.xlu1 %668, %v235_v17   ;;  %251 = vperm.xlu0 %667, %v233_v18   ;;  %v238_v24 = vld [vmem:[#allocation7 + $0x28] sm:$0xff]  ;;  %v237_v28 = vld [vmem:[#allocation7 + $0x20] sm:$0xff]  ;;  %v86_v31 = vld [vmem:[#allocation5 + $0x70] sm:$0xff]  ;;  %p743_p0 = pnand %p742_p13, %p736_p10 }
  0x3e   :  { %617 = vmatpush3.bf16.msra.mxu0 %v614_v6  ;;  %651 = vmatpush3.bf16.msra.mxu1 %v614_v6  ;;  %v85_v27 = vld [vmem:[#allocation5 + $0x68] sm:$0xff]  ;;  %v87_v32 = vld [vmem:[#allocation5 + $0x78] sm:$0xff]  ;;  %v239_v33 = vld [vmem:[#allocation7 + $0x30] sm:$0xff] }
  0x3f   :  { %619 = vmatprep.subr.bf16.mxu0 %v618_v9  ;;  %644 = vmatprep.subr.bf16.mxu1 %v618_v9  ;;  %v634_v30 = vpack.c.bf16 %v85_v27, %v84_v26  ;;  %v242_v34 = vld [vmem:[#allocation7 + $0x48] sm:$0xff]  ;;  %v638_v35 = vpack.c.bf16 %v87_v32, %v86_v31  ;;  %v241_v36 = vld [vmem:[#allocation7 + $0x40] sm:$0xff]  ;;  %v244_v37 = vld [vmem:[#allocation7 + $0x58] sm:$0xff] }
  0x40   :  { %v243_v38 = vld [vmem:[#allocation7 + $0x50] sm:$0xff]  ;;  %v57_v39 = vld [vmem:[#allocation2 + $0x8] sm:$0xff]  ;;  %v245_v44 = vld [vmem:[#allocation7 + $0x60] sm:$0xff] }
  0x41   :  { %266 = vperm.xlu1 %668, %v236_v19   ;;  %256 = vperm.xlu0 %667, %v234_v23   ;;  %v65_v40 = vld [vmem:[#allocation2 + $0x48] sm:$0xff]  ;;  %v58_v41 = vld [vmem:[#allocation2 + $0x10] sm:$0xff]  ;;  %v59_v45 = vld [vmem:[#allocation2 + $0x18] sm:$0xff] }
  0x42   :  { %621 = vmatpush3.bf16.msra.mxu0 %v618_v9  ;;  %652 = vmatpush3.bf16.msra.mxu1 %v618_v9  ;;  %v66_v42 = vld [vmem:[#allocation2 + $0x50] sm:$0xff]  ;;  %v246_v43 = vld [vmem:[#allocation7 + $0x68] sm:$0xff]  ;;  %v67_v46 = vld [vmem:[#allocation2 + $0x58] sm:$0xff] }
  0x43   :  { %623 = vmatprep.subr.bf16.mxu0 %v622_v14  ;;  %645 = vmatprep.subr.bf16.mxu1 %v622_v14  ;;  %v60_v47 = vld [vmem:[#allocation2 + $0x20] sm:$0xff]  ;;  %v248_v49 = vld [vmem:[#allocation7 + $0x78] sm:$0xff]  ;;  %v247_v50 = vld [vmem:[#allocation7 + $0x70] sm:$0xff] }
  0x44   :  { %v68_v48 = vld [vmem:[#allocation2 + $0x60] sm:$0xff]  ;;  %v61_v51 = vld [vmem:[#allocation2 + $0x28] sm:$0xff]  ;;  %v62_v53 = vld [vmem:[#allocation2 + $0x30] sm:$0xff] }
  0x45   :  { %276 = vperm.xlu1 %668, %v238_v24   ;;  %271 = vperm.xlu0 %667, %v237_v28   ;;  %v69_v52 = vld [vmem:[#allocation2 + $0x68] sm:$0xff]  ;;  %v70_v54 = vld [vmem:[#allocation2 + $0x70] sm:$0xff]  ;;  %v63_v55 = vld [vmem:[#allocation2 + $0x38] sm:$0xff] }
  0x46   :  { %625 = vmatpush3.bf16.msra.mxu0 %v622_v14  ;;  %653 = vmatpush3.bf16.msra.mxu1 %v622_v14  ;;  %v71_v56 = vld [vmem:[#allocation2 + $0x78] sm:$0xff] }
  0x47   :  { %627 = vmatprep.subr.bf16.mxu0 %v626_v20  ;;  %646 = vmatprep.subr.bf16.mxu1 %v626_v20 }
  0x49   :  { %286 = vperm.xlu1 %668, %v240_v29   ;;  %281 = vperm.xlu0 %667, %v239_v33  }
  0x4a   :  { %629 = vmatpush3.bf16.msra.mxu0 %v626_v20  ;;  %654 = vmatpush3.bf16.msra.mxu1 %v626_v20 }
  0x4b   :  { %631 = vmatprep.subr.bf16.mxu0 %v630_v25  ;;  %647 = vmatprep.subr.bf16.mxu1 %v630_v25 }
  0x4d   :  { %296 = vperm.xlu1 %668, %v242_v34   ;;  %291 = vperm.xlu0 %667, %v241_v36  }
  0x4e   :  { %633 = vmatpush3.bf16.msra.mxu0 %v630_v25  ;;  %655 = vmatpush3.bf16.msra.mxu1 %v630_v25 }
  0x4f   :  { %635 = vmatprep.subr.bf16.mxu0 %v634_v30  ;;  %648 = vmatprep.subr.bf16.mxu1 %v634_v30 }
  0x51   :  { %306 = vperm.xlu1 %668, %v244_v37   ;;  %301 = vperm.xlu0 %667, %v243_v38  }
  0x52   :  { %637 = vmatpush3.bf16.msra.mxu0 %v634_v30  ;;  %656 = vmatpush3.bf16.msra.mxu1 %v634_v30 }
  0x53   :  { %639 = vmatprep.subr.bf16.mxu0 %v638_v35  ;;  %649 = vmatprep.subr.bf16.mxu1 %v638_v35 }
  0x55   :  { %316 = vperm.xlu1 %668, %v246_v43   ;;  %311 = vperm.xlu0 %667, %v245_v44  }
  0x56   :  { %641 = vmatpush3.bf16.msra.mxu0 %v638_v35  ;;  %657 = vmatpush3.bf16.msra.mxu1 %v638_v35 }
  0x59   :  { %587 = vmatmul.mubr.f32.vlgmr.msra.gmra.mrb[0].mxu0 %v57_v39  ;;  %599 = vmatmul.mubr.f32.vlgmr.msra.gmra.mrb[0].mxu1 %v65_v40 }
  0x5a   :  { %589 = vmatprep.mubr.f32.mxu0 %v58_v41  ;;  %601 = vmatprep.mubr.f32.mxu1 %v66_v42 }
  0x5b   :  { %326 = vperm.xlu1 %668, %v248_v49   ;;  %321 = vperm.xlu0 %667, %v247_v50  }
  0x5d   :  { %590 = vmatmul.mubr.f32.gmra.mrb[2].mxu0 %v59_v45  ;;  %602 = vmatmul.mubr.f32.gmra.mrb[2].mxu1 %v67_v46 }
  0x5e   :  { %592 = vmatprep.mubr.f32.mxu0 %v60_v47  ;;  %604 = vmatprep.mubr.f32.mxu1 %v68_v48 }
  0x61   :  { %593 = vmatmul.mubr.f32.gmra.mrb[4].mxu0 %v61_v51  ;;  %605 = vmatmul.mubr.f32.gmra.mrb[4].mxu1 %v69_v52 }
  0x62   :  { %595 = vmatprep.mubr.f32.mxu0 %v62_v53  ;;  %607 = vmatprep.mubr.f32.mxu1 %v70_v54 }
  0x65   :  { %596 = vmatmul.mubr.f32.gmra.mrb[6].mxu0 %v63_v55  ;;  %608 = vmatmul.mubr.f32.gmra.mrb[6].mxu1 %v71_v56 }
  0xbc   :  { %v262_v57 = vpop.permute.xlu1 %261  ;;  %v252_v58 = vpop.permute.xlu0 %251 }
  0xc0   :  { %v267_v59 = vpop.permute.xlu1 %266  ;;  %v257_v60 = vpop.permute.xlu0 %256 }
  0xc4   :  { %v277_v61 = vpop.permute.xlu1 %276  ;;  %v272_v62 = vpop.permute.xlu0 %271 }
  0xc8   :  { %v287_v63 = vpop.permute.xlu1 %286  ;;  %v282_v0 = vpop.permute.xlu0 %281 }
  0xcc   :  { %v297_v1 = vpop.permute.xlu1 %296  ;;  %v292_v2 = vpop.permute.xlu0 %291 }
  0xd0   :  { %v307_v3 = vpop.permute.xlu1 %306  ;;  %v302_v4 = vpop.permute.xlu0 %301 }
  0xd4   :  { %v317_v13 = vpop.permute.xlu1 %316  ;;  %v312_v14 = vpop.permute.xlu0 %311 }
  0xda   :  { %v327_v35 = vpop.permute.xlu1 %326  ;;  %v322_v36 = vpop.permute.xlu0 %321 }
 0x12c   :  { %v588_v5 = vpop.f32.mrb[0].mxu0  ;;  %v600_v6 = vpop.f32.mrb[0].mxu1 }
 0x12d   :  { %v330_v7 = vmul.f32 %v588_v5, %v257_v60  ;;  %v338_v8 = vmul.f32 %v600_v6, %v297_v1  ;;  %v154_v9 = vpop.f32.mrb[1].mxu0  ;;  %v194_v10 = vpop.f32.mrb[1].mxu1 }
 0x12e   :  { %v329_v11 = vmul.f32 %v252_v58, %v154_v9  ;;  %v337_v12 = vmul.f32 %v292_v2, %v194_v10 }
 0x130   :  { %v478_v15 = vpack.c.bf16 %v330_v7, %v329_v11  ;;  %v498_v16 = vpack.c.bf16 %v338_v8, %v337_v12  ;;  %v591_v17 = vpop.f32.mrb[2].mxu0  ;;  %v603_v18 = vpop.f32.mrb[2].mxu1 }
 0x131   :  { %v332_v19 = vmul.f32 %v591_v17, %v267_v59  ;;  %v340_v20 = vmul.f32 %v603_v18, %v307_v3  ;;  %v164_v21 = vpop.f32.mrb[3].mxu0  ;;  %v204_v22 = vpop.f32.mrb[3].mxu1 }
 0x132   :  { %479 = vst [vmem:[#allocation8] sm:$0xff] %v478_v15   ;;  %518 = vst [vmem:[#allocation8 + $0x20] sm:$0xff] %v498_v16   ;;  %v331_v23 = vmul.f32 %v262_v57, %v164_v21  ;;  %v339_v24 = vmul.f32 %v302_v4, %v204_v22 }
 0x134   :  { %v483_v25 = vpack.c.bf16 %v332_v19, %v331_v23  ;;  %v503_v26 = vpack.c.bf16 %v340_v20, %v339_v24  ;;  %v594_v27 = vpop.f32.mrb[4].mxu0  ;;  %v606_v28 = vpop.f32.mrb[4].mxu1 }
 0x135   :  { %v334_v29 = vmul.f32 %v594_v27, %v277_v61  ;;  %v342_v30 = vmul.f32 %v606_v28, %v317_v13  ;;  %v174_v31 = vpop.f32.mrb[5].mxu0  ;;  %v214_v32 = vpop.f32.mrb[5].mxu1 }
 0x136   :  { %515 = vst [vmem:[#allocation8 + $0x8] sm:$0xff] %v483_v25   ;;  %519 = vst [vmem:[#allocation8 + $0x28] sm:$0xff] %v503_v26   ;;  %v333_v33 = vmul.f32 %v272_v62, %v174_v31  ;;  %v341_v34 = vmul.f32 %v312_v14, %v214_v32 }
 0x138   :  { %v488_v37 = vpack.c.bf16 %v334_v29, %v333_v33  ;;  %v508_v38 = vpack.c.bf16 %v342_v30, %v341_v34  ;;  %v597_v39 = vpop.f32.mrb[6].mxu0  ;;  %v609_v40 = vpop.f32.mrb[6].mxu1 }
 0x139   :  { %v336_v41 = vmul.f32 %v597_v39, %v287_v63  ;;  %v344_v42 = vmul.f32 %v609_v40, %v327_v35  ;;  %v184_v43 = vpop.f32.mrb[7].mxu0  ;;  %v224_v44 = vpop.f32.mrb[7].mxu1 }
 0x13a   :  { %516 = vst [vmem:[#allocation8 + $0x10] sm:$0xff] %v488_v37   ;;  %520 = vst [vmem:[#allocation8 + $0x30] sm:$0xff] %v508_v38   ;;  %v335_v45 = vmul.f32 %v282_v0, %v184_v43  ;;  %v343_v46 = vmul.f32 %v322_v36, %v224_v44 }
 0x13c   :  { %v493_v47 = vpack.c.bf16 %v336_v41, %v335_v45  ;;  %v513_v48 = vpack.c.bf16 %v344_v42, %v343_v46 }
 0x13e   :  { %517 = vst [vmem:[#allocation8 + $0x18] sm:$0xff] %v493_v47   ;;  %521 = vst [vmem:[#allocation8 + $0x38] sm:$0xff] %v513_v48  }
 0x13f   :  { %746 = shalt.err (!%p743_p0)
}
 0x140   :  { %s747_s25 = scalar_lea.hbm %s859_s3, 1024 }
 0x141   :  { %p748_p1 = scmp.ne.s32.totalorder %s859_s3, %s747_s25  ;;  %p751_p2 = scmp.lt.u32.totalorder %s747_s25, %s859_s3 }
 0x143   :  { %p753_p3 = pnand %p751_p2, %p748_p1 }
 0x145   :  { %756 = shalt.err (!%p753_p3)
}
 0x146   :  { %s770_s30 = smov 64   ;;  %s771_s4 = smov 4  }
 0x147   :  { %436 = dma.vmem_to_hbm [thread:$0]  %s431_s21, 1024, %s859_s3, [#allocation4], %s770_s30, %s770_s30, %s771_s4  }
 0x148   :  { %761 = dma.done.wait [#allocation4], 1024  }
 0x149   :  { %762 = vsyncadd [#allocation4], 4294966272 }
 0x14a   :  { %440 = vsyncpa [#allocation3], 1 }
 0x14b   :  { %441 = vsyncpa [#allocation6], 1 }
 0x14c   :  { %442 = vsyncpa [#allocation4], 1 }

</bundles_post_ra>
